<compile_context>
chip_gen: v7x
topology: tpu7x:2x2x1
jax: 0.10.0
libtpu: 0.0.40
codegen_flags: <defaults>
</compile_context>

<pallas_src>
import jax
import jax.numpy as jnp
from jax import lax
from jax.experimental import pallas as pl
from jax.experimental.pallas import tpu as pltpu


# ----------------------------------------------------------------------------
# Tiling helpers
# ----------------------------------------------------------------------------
def _round_up(x, m):
    return ((x + m - 1) // m) * m


def _choose_tiles(B, Dp, K, grad_bytes):
    """Rows-per-grid-step (Bt) and padded batch size (B_pad)."""
    if B <= 16:
        return B, B                       # single step, block == full array dims
    # Bytes through VMEM per batch row (inputs + outputs), double-buffered.
    row_in = (K * grad_bytes + 3 * 4) * Dp        # K deltas + g_hat/points/prev_points
    row_out = 2 * 4 * Dp                          # z + new best points (f32)
    row_bytes = 2 * (row_in + row_out)
    budget = 12 * 1024 * 1024                     # < 32 MiB scoped VMEM on all gens
    bt = (budget // row_bytes) // 16 * 16
    bt = max(16, min(512, bt))
    # keep >= 2 grid steps so dimension_semantics=("parallel",) can split rows
    # across the two v7x TensorCores
    bt = min(bt, max(16, _round_up(B, 32) // 2))
    return bt, _round_up(B, bt)


# ----------------------------------------------------------------------------
# Pallas kernel (closure over the number of loss terms K)
# ----------------------------------------------------------------------------
def _make_bp_kernel(K):
    def kernel(lr_ref, g_ref, p_ref, losses_ref, prev_l_ref, prev_p_ref,
               mask_ref, *rest):
        """
        lr_ref:     (1, 2)   SMEM  [lr_adv, lr_grad]
        g_ref:      (Bt, Dp)       g_hat (f32), Dp = round_up(3N, 128)
        p_ref:      (Bt, Dp)       current points (f32)
        losses_ref: (Bt, K)        current per-loss values (f32)
        prev_l_ref: (Bt, K)        previous best losses (f32, aliased to out 1)
        prev_p_ref: (Bt, Dp)       previous best points (f32, aliased to out 2)
        mask_ref:   (Bt, 1)        in_out mask (1.0 where pred != target)
        rest[:K]:   (Bt, Dp)       per-loss gradients (bf16 storage)
        rest[K:]:   z, out_losses, out_points
        """
        d_refs = rest[:K]
        z_ref, out_l_ref, out_p_ref = rest[K], rest[K + 1], rest[K + 2]

        lr_adv = lr_ref[0, 0]
        lr_grad = lr_ref[0, 1]

        g = g_ref[...].astype(jnp.float32)        # (Bt, Dp)
        pts = p_ref[...].astype(jnp.float32)      # (Bt, Dp)
        in_out = mask_ref[...] > 0.0              # (Bt, 1) bool
        losses = losses_ref[...]                  # (Bt, K)
        prev_l = prev_l_ref[...]                  # (Bt, K)

        # update_mask = in_out AND (prev_best_losses >= losses).all(-1)
        all_leq = jnp.all(prev_l >= losses, axis=-1, keepdims=True)
        update = jnp.logical_and(in_out, all_leq)

        out_l_ref[...] = jnp.where(update, losses, prev_l)
        out_p_ref[...] = jnp.where(update, pts, prev_p_ref[...]).astype(out_p_ref.dtype)

        z_grad = pts - g * lr_grad
        any_in = jnp.any(in_out)
        eps = jnp.float32(1e-12)

        @pl.when(any_in)
        def _():
            # Gram-Schmidt; cache 1/(b.b) once per appended basis vector.
            den_g = jnp.sum(g * g, axis=-1, keepdims=True)            # (Bt, 1)
            basis = [(g, pl.reciprocal(jnp.maximum(den_g, eps)))]      # exact recip
            alpha_hat = jnp.zeros_like(g)
            for k in range(K):
                alpha = d_refs[k][...].astype(jnp.float32)             # (Bt, Dp)
                for b, inv_den in basis:
                    num = jnp.sum(alpha * b, axis=-1, keepdims=True)   # (Bt, 1)
                    alpha = alpha - (num * inv_den) * b
                # _normalize(alpha, dim=(1,2)): alpha / max(||alpha||, eps)
                sumsq = jnp.sum(alpha * alpha, axis=-1, keepdims=True)
                alpha_n = alpha * lax.rsqrt(jnp.maximum(sumsq, eps * eps))
                if k < K - 1:   # last basis vector is never projected against
                    den_n = jnp.sum(alpha_n * alpha_n, axis=-1, keepdims=True)
                    basis.append((alpha_n, pl.reciprocal(jnp.maximum(den_n, eps))))
                alpha_hat = alpha_hat + alpha_n
            z_adv = pts - alpha_hat * lr_adv
            z_ref[...] = jnp.where(in_out, z_adv, z_grad).astype(z_ref.dtype)

        @pl.when(jnp.logical_not(any_in))
        def _():
            z_ref[...] = z_grad.astype(z_ref.dtype)

    return kernel


# ----------------------------------------------------------------------------
# One fused, jitted attack step: losses + grads + Pallas projection/update
# ----------------------------------------------------------------------------
def _build_step_fn(optims, grad_dtype=jnp.bfloat16):
    K = len(optims)
    grad_bytes = jnp.dtype(grad_dtype).itemsize

    def step(points, ori_points, normal_vec, g_hat, logits, target,
             prev_l_pad, prev_p_pad, lr_arr):
        B, N, C = points.shape
        D = N * C
        Dp = _round_up(D, 128)
        Bt, B_pad = _choose_tiles(B, Dp, K, grad_bytes)
        assert prev_l_pad.shape == (B_pad, K)
        assert prev_p_pad.shape == (B_pad, Dp)

        # ---- per-loss values + gradients (grad of each loss.sum() w.r.t. points)
        loss_list, delta_list = [], []
        for fn, need_normal in optims:
            if need_normal:
                lfn = (lambda p, f=fn: f(p, ori_points, normal_vec))
            else:
                lfn = (lambda p, f=fn: f(p, ori_points))

            def summed(p, f=lfn):
                v = f(p)
                return jnp.sum(v), v

            (_, per_batch), grad = jax.value_and_grad(summed, has_aux=True)(points)
            loss_list.append(per_batch.astype(jnp.float32))
            delta_list.append(grad)
        losses = jnp.stack(loss_list, axis=1)                       # (B, K)
        in_out = (jnp.argmax(logits, axis=-1) != target)            # (B,)

        # ---- lane-dense (128-multiple) flattening; all padding is zeros ----
        def flat_pad(x, dtype):
            x = x.reshape(B, D).astype(dtype)
            return jnp.pad(x, ((0, B_pad - B), (0, Dp - D)))

        g_f = flat_pad(g_hat, jnp.float32)
        p_f = flat_pad(points, jnp.float32)
        d_fs = tuple(flat_pad(d, grad_dtype) for d in delta_list)   # bf16 storage
        losses_f = jnp.pad(losses, ((0, B_pad - B), (0, 0)))
        mask_f = jnp.pad(in_out.astype(jnp.float32).reshape(B, 1),
                         ((0, B_pad - B), (0, 0)))

        grid = (B_pad // Bt,)
        row = lambda b: (b, 0)

        in_specs = [
            pl.BlockSpec(memory_space=pltpu.MemorySpace.SMEM),  # learning rates
            pl.BlockSpec((Bt, Dp), row),                        # g_hat
            pl.BlockSpec((Bt, Dp), row),                        # points
            pl.BlockSpec((Bt, K), row),                         # losses
            pl.BlockSpec((Bt, K), row),                         # prev best losses
            pl.BlockSpec((Bt, Dp), row),                        # prev best points
            pl.BlockSpec((Bt, 1), row),                         # in_out mask
        ] + [pl.BlockSpec((Bt, Dp), row) for _ in range(K)]      # K deltas

        out_shapes = (
            jax.ShapeDtypeStruct((B_pad, Dp), jnp.float32),      # z (new points)
            jax.ShapeDtypeStruct((B_pad, K), jnp.float32),       # new best losses
            jax.ShapeDtypeStruct((B_pad, Dp), jnp.float32),      # new best points
        )

        z_pad, new_l, new_p = pl.pallas_call(
            _make_bp_kernel(K),
            out_shape=out_shapes,
            grid=grid,
            in_specs=in_specs,
            out_specs=(pl.BlockSpec((Bt, Dp), row),
                       pl.BlockSpec((Bt, K), row),
                       pl.BlockSpec((Bt, Dp), row)),
            # carried best-losses / best-points are aliased in-place
            input_output_aliases={4: 1, 5: 2},
            compiler_params=pltpu.CompilerParams(
                dimension_semantics=("parallel",),
                vmem_limit_bytes=32 * 1024 * 1024),
        )(lr_arr, g_f, p_f, losses_f, prev_l_pad, prev_p_pad, mask_f, *d_fs)

        z = z_pad[:B, :D].reshape(B, N, C).astype(points.dtype)
        return z, new_l, new_p

    return jax.jit(step, donate_argnums=(6, 7))


# ----------------------------------------------------------------------------
# Loss functions (plain JAX, differentiated via jax.value_and_grad)
# NOTE: the original norm_l2_loss / pseudo_chamfer_loss / hausdorff_loss bodies
# are not in the reference source; standard deterministic definitions are used.
# ----------------------------------------------------------------------------
def norm_l2_loss(adv, ori):
    return jnp.sum((adv - ori) ** 2, axis=(1, 2))


def hausdorff_loss(adv, ori):
    d = jnp.sum((adv[:, :, None, :] - ori[:, None, :, :]) ** 2, axis=-1)
    return jnp.max(jnp.min(d, axis=2), axis=1)


def pseudo_chamfer_loss(adv, ori):
    d = jnp.sum((adv[:, :, None, :] - ori[:, None, :, :]) ** 2, axis=-1)
    return jnp.mean(jnp.min(d, axis=2), axis=1)


# ----------------------------------------------------------------------------
# Module
# ----------------------------------------------------------------------------
class BoundaryProjection3:
    def __init__(self, l2_weight, hd_weight, cd_weight, curv_weight,
                 curv_loss_knn, step_size, stage2_steps, max_steps,
                 exponential_step):
        self.l2_weight = l2_weight
        self.hd_weight = hd_weight
        self.cd_weight = cd_weight
        self.curv_weight = curv_weight
        self.curv_loss_knn = curv_loss_knn
        self.step_size = step_size
        self.stage2_step_size = stage2_steps
        self.max_steps = max_steps
        self.exponential_step = exponential_step
        self.epoch = 0
        self.output_losses = None
        self.output_points = None
        self.in_out = False

        self.gamma = 0.06
        self.initial_lr = 0.03
        self.learning_rate = self.initial_lr
        self.grad_lr = self.initial_lr

        self._grad_dtype = jnp.bfloat16       # storage dtype for the big delta arrays
        self.prepare_optim_loss()
        self._step_fn = _build_step_fn(self.optims, self._grad_dtype)
        self._best_losses_pad = None          # (B_pad, K) f32, carried & donated
        self._best_points_pad = None          # (B_pad, Dp) f32, carried & donated

    def prepare_optim_loss(self):
        self.optims = []   # (fn, need_normal) in the torch module's order
        if self.l2_weight != 0.0:
            self.optims.append((norm_l2_loss, False))
        if self.hd_weight != 0.0:
            self.optims.append((hausdorff_loss, False))
        if self.curv_weight != 0.0:
            # TODO(synk): local_curvature_loss (kNN-based) body is not in the reference source.
            raise NotImplementedError("local_curvature_loss not available")
        if self.cd_weight != 0.0:
            self.optims.append((pseudo_chamfer_loss, False))

    def reset(self, batch_size, device=None):
        self.learning_rate = self.initial_lr
        self.grad_lr = self.initial_lr
        self.output_losses = jnp.full((batch_size, len(self.optims)), 100000.0,
                                      jnp.float32)
        self.output_points = None
        self._best_losses_pad = None
        self._best_points_pad = None

    def _init_state(self, points):
        B, N, C = points.shape
        K = len(self.optims)
        D = N * C
        Dp = _round_up(D, 128)
        _, B_pad = _choose_tiles(B, Dp, K, jnp.dtype(self._grad_dtype).itemsize)
        if self.output_losses is None:
            self.output_losses = jnp.full((B, K), 100000.0, jnp.float32)
        self._best_losses_pad = jnp.pad(self.output_losses.astype(jnp.float32),
                                        ((0, B_pad - B), (0, 0)),
                                        constant_values=100000.0)
        p_flat = points.reshape(B, D).astype(jnp.float32)
        self._best_points_pad = jnp.pad(p_flat, ((0, B_pad - B), (0, Dp - D)))
        if self.output_points is None:
            self.output_points = points

    def forward(self, points, ori_points, normal_vec, g_hat, logits, target):
        B, N, C = points.shape
        if self._best_points_pad is None:
            self._init_state(points)

        if self.exponential_step:
            lr_adv, lr_grad = self.learning_rate, self.grad_lr
        else:
            lr_adv, lr_grad = self.step_size, self.step_size
        lr_arr = jnp.array([[lr_adv, lr_grad]], dtype=jnp.float32)   # SMEM scalars

        z, new_l, new_p = self._step_fn(
            points, ori_points, normal_vec, g_hat, logits, target,
            self._best_losses_pad, self._best_points_pad, lr_arr)

        self._best_losses_pad = new_l
        self._best_points_pad = new_p
        D = N * C
        self.output_losses = new_l[:B]
        self.output_points = new_p[:B, :D].reshape(B, N, C).astype(points.dtype)
        self.update_step_size()
        return z

    __call__ = forward

    def update_step_size(self):
        self.learning_rate = self.learning_rate * (1 - self.gamma)
        self.grad_lr = self.grad_lr * (1 - self.gamma)


# ----------------------------------------------------------------------------
if __name__ == "__main__":
    key = jax.random.PRNGKey(0)
    B, N, NUM_CLASSES = 2, 64, 8
    k1, k2, k3, k4, k5 = jax.random.split(key, 5)

    points = jax.random.normal(k1, (B, N, 3), jnp.float32)
    ori_points = points + 0.05 * jax.random.normal(k2, (B, N, 3), jnp.float32)
    normal_vec = jax.random.normal(k3, (B, N, 3), jnp.float32)
    g_hat = jax.random.normal(k4, (B, N, 3), jnp.float32)
    g_hat = g_hat / jnp.linalg.norm(g_hat.reshape(B, -1), axis=1)[:, None, None]
    logits = jax.random.normal(k5, (B, NUM_CLASSES), jnp.float32)
    target = jnp.array([0, 1], dtype=jnp.int32)

    bp = BoundaryProjection3(l2_weight=1.0, hd_weight=0.0, cd_weight=1.0,
                             curv_weight=0.0, curv_loss_knn=16, step_size=0.01,
                             stage2_steps=0.005, max_steps=100,
                             exponential_step=True)
    bp.reset(B)

    # two attack steps: exercises the donated carried state and lr decay
    z1 = bp.forward(points, ori_points, normal_vec, g_hat, logits, target)
    z2 = bp.forward(z1, ori_points, normal_vec, g_hat, logits, target)
    jax.block_until_ready(z2)
    jax.block_until_ready(bp.output_losses)
    jax.block_until_ready(bp.output_points)

    assert z1.shape == (B, N, 3) and z2.shape == (B, N, 3)
    assert bp.output_losses.shape == (B, 2)
    assert bp.output_points.shape == (B, N, 3)
    assert bool(jnp.all(jnp.isfinite(z2)))
    assert bool(jnp.all(jnp.isfinite(bp.output_losses)))
    print("KERNEL_OK")
</pallas_src>

<mosaic_0001>
module attributes {stable_mosaic.version = 11 : i64} {
  func.func @kernel(%arg0: i32, %arg1: memref<1x2xf32, #tpu.memory_space<smem>>, %arg2: memref<2x256xf32, #tpu.memory_space<vmem>>, %arg3: memref<2x256xf32, #tpu.memory_space<vmem>>, %arg4: memref<2x2xf32, #tpu.memory_space<vmem>>, %arg5: memref<2x2xf32, #tpu.memory_space<vmem>>, %arg6: memref<2x256xf32, #tpu.memory_space<vmem>>, %arg7: memref<2x1xf32, #tpu.memory_space<vmem>>, %arg8: memref<2x256xbf16, #tpu.memory_space<vmem>>, %arg9: memref<2x256xbf16, #tpu.memory_space<vmem>>, %arg10: memref<2x256xf32, #tpu.memory_space<vmem>>, %arg11: memref<2x2xf32, #tpu.memory_space<vmem>>, %arg12: memref<2x256xf32, #tpu.memory_space<vmem>>) attributes {dimension_semantics = [#tpu.dimension_semantics<parallel>], iteration_bounds = array<i64: 1>, scalar_prefetch = 0 : i64, scratch_operands = 0 : i64, tpu.core_type = #tpu.core_type<tc>, window_params = [{transform_indices = @transform_0, window_bounds = array<i64: 1, 2>}, {transform_indices = @transform_1, window_bounds = array<i64: 2, 256>}, {transform_indices = @transform_2, window_bounds = array<i64: 2, 256>}, {transform_indices = @transform_3, window_bounds = array<i64: 2, 2>}, {transform_indices = @transform_4, window_bounds = array<i64: 2, 2>}, {transform_indices = @transform_5, window_bounds = array<i64: 2, 256>}, {transform_indices = @transform_6, window_bounds = array<i64: 2, 1>}, {transform_indices = @transform_7, window_bounds = array<i64: 2, 256>}, {transform_indices = @transform_8, window_bounds = array<i64: 2, 256>}, {transform_indices = @transform_9, window_bounds = array<i64: 2, 256>}, {transform_indices = @transform_10, window_bounds = array<i64: 2, 2>}, {transform_indices = @transform_11, window_bounds = array<i64: 2, 256>}]} {
    %c0 = arith.constant 0 : index
    %c0_0 = arith.constant 0 : index
    %0 = memref.load %arg1[%c0, %c0_0] : memref<1x2xf32, #tpu.memory_space<smem>>
    %c0_1 = arith.constant 0 : index
    %c1 = arith.constant 1 : index
    %1 = memref.load %arg1[%c0_1, %c1] : memref<1x2xf32, #tpu.memory_space<smem>>
    %c0_2 = arith.constant 0 : index
    %c0_3 = arith.constant 0 : index
    %2 = vector.load %arg2[%c0_2, %c0_3] : memref<2x256xf32, #tpu.memory_space<vmem>>, vector<2x256xf32>
    %c0_4 = arith.constant 0 : index
    %c0_5 = arith.constant 0 : index
    %3 = vector.load %arg3[%c0_4, %c0_5] : memref<2x256xf32, #tpu.memory_space<vmem>>, vector<2x256xf32>
    %c0_6 = arith.constant 0 : index
    %c0_7 = arith.constant 0 : index
    %4 = vector.load %arg7[%c0_6, %c0_7] : memref<2x1xf32, #tpu.memory_space<vmem>>, vector<2x1xf32>
    %cst = arith.constant 0.000000e+00 : f32
    %5 = vector.broadcast %cst : f32 to vector<2x1xf32>
    %6 = arith.cmpf ogt, %4, %5 : vector<2x1xf32>
    %c0_8 = arith.constant 0 : index
    %c0_9 = arith.constant 0 : index
    %7 = vector.load %arg4[%c0_8, %c0_9] : memref<2x2xf32, #tpu.memory_space<vmem>>, vector<2x2xf32>
    %c0_10 = arith.constant 0 : index
    %c0_11 = arith.constant 0 : index
    %8 = vector.load %arg5[%c0_10, %c0_11] : memref<2x2xf32, #tpu.memory_space<vmem>>, vector<2x2xf32>
    %9 = arith.cmpf oge, %8, %7 : vector<2x2xf32>
    %cst_12 = arith.constant 1.000000e+00 : f32
    %cst_13 = arith.constant 0.000000e+00 : f32
    %10 = vector.broadcast %cst_12 : f32 to vector<2x2xf32>
    %11 = vector.broadcast %cst_13 : f32 to vector<2x2xf32>
    %12 = arith.select %9, %10, %11 : vector<2x2xi1>, vector<2x2xf32>
    %cst_14 = arith.constant dense<0x7F800000> : vector<2xf32>
    %13 = vector.multi_reduction <minimumf>, %12, %cst_14 [1] : vector<2x2xf32> to vector<2xf32>
    %cst_15 = arith.constant 0.000000e+00 : f32
    %14 = vector.broadcast %cst_15 : f32 to vector<2xf32>
    %15 = arith.cmpf ogt, %13, %14 : vector<2xf32>
    %16 = vector.shape_cast %15 : vector<2xi1> to vector<2x1xi1>
    %17 = arith.andi %6, %16 : vector<2x1xi1>
    %18 = vector.shape_cast %17 : vector<2x1xi1> to vector<2x1xi1>
    %19 = vector.broadcast %18 : vector<2x1xi1> to vector<2x2xi1>
    %20 = arith.select %19, %7, %8 : vector<2x2xi1>, vector<2x2xf32>
    %c0_16 = arith.constant 0 : index
    %c0_17 = arith.constant 0 : index
    %21 = vector.load %arg11[%c0_16, %c0_17] : memref<2x2xf32, #tpu.memory_space<vmem>>, vector<2x2xf32>
    tpu.vector_store %arg11[%c0_16, %c0_17], %20 {strides = array<i32>} : memref<2x2xf32, #tpu.memory_space<vmem>>, vector<2x2xf32>,
    %c0_18 = arith.constant 0 : index
    %c0_19 = arith.constant 0 : index
    %22 = vector.load %arg6[%c0_18, %c0_19] : memref<2x256xf32, #tpu.memory_space<vmem>>, vector<2x256xf32>
    %23 = vector.shape_cast %17 : vector<2x1xi1> to vector<2x1xi1>
    %24 = vector.broadcast %23 : vector<2x1xi1> to vector<2x256xi1>
    %25 = arith.select %24, %3, %22 : vector<2x256xi1>, vector<2x256xf32>
    %c0_20 = arith.constant 0 : index
    %c0_21 = arith.constant 0 : index
    %26 = vector.load %arg12[%c0_20, %c0_21] : memref<2x256xf32, #tpu.memory_space<vmem>>, vector<2x256xf32>
    tpu.vector_store %arg12[%c0_20, %c0_21], %25 {strides = array<i32>} : memref<2x256xf32, #tpu.memory_space<vmem>>, vector<2x256xf32>,
    %27 = vector.broadcast %1 : f32 to vector<2x256xf32>
    %28 = arith.mulf %2, %27 : vector<2x256xf32>
    %29 = arith.subf %3, %28 : vector<2x256xf32>
    %cst_22 = arith.constant 1.000000e+00 : f32
    %cst_23 = arith.constant 0.000000e+00 : f32
    %30 = vector.broadcast %cst_22 : f32 to vector<2x1xf32>
    %31 = vector.broadcast %cst_23 : f32 to vector<2x1xf32>
    %32 = arith.select %6, %30, %31 : vector<2x1xi1>, vector<2x1xf32>
    %33 = vector.shape_cast %32 : vector<2x1xf32> to vector<1x2x1xf32>
    %cst_24 = arith.constant dense<0xFF800000> : vector<1xf32>
    %34 = vector.multi_reduction <maximumf>, %33, %cst_24 [1, 2] : vector<1x2x1xf32> to vector<1xf32>
    %35 = vector.shape_cast %34 : vector<1xf32> to vector<1x1x1xf32>
    %36 = vector.extract %35[0, 0, 0] : f32 from vector<1x1x1xf32>
    %cst_25 = arith.constant 0.000000e+00 : f32
    %37 = arith.cmpf ogt, %36, %cst_25 : f32
    %38 = arith.extui %37 : i1 to i32
    %cst_26 = arith.constant 9.99999996E-13 : f32
    %c0_i32 = arith.constant 0 : i32
    %39 = arith.cmpi ne, %38, %c0_i32 : i32
    scf.if %39 {
      %43 = arith.mulf %2, %2 : vector<2x256xf32>
      %cst_28 = arith.constant dense<0.000000e+00> : vector<2xf32>
      %44 = vector.multi_reduction <add>, %43, %cst_28 [1] : vector<2x256xf32> to vector<2xf32>
      %45 = vector.shape_cast %44 : vector<2xf32> to vector<2x1xf32>
      %46 = vector.broadcast %cst_26 : f32 to vector<2x1xf32>
      %47 = arith.maximumf %45, %46 : vector<2x1xf32>
      %48 = tpu.reciprocal %47 : vector<2x1xf32> -> vector<2x1xf32>
      %cst_29 = arith.constant 0.000000e+00 : f32
      %49 = vector.broadcast %cst_29 : f32 to vector<2x256xf32>
      %c0_30 = arith.constant 0 : index
      %c0_31 = arith.constant 0 : index
      %50 = vector.load %arg8[%c0_30, %c0_31] : memref<2x256xbf16, #tpu.memory_space<vmem>>, vector<2x256xbf16>
      %51 = arith.extf %50 : vector<2x256xbf16> to vector<2x256xf32>
      %52 = arith.mulf %51, %2 : vector<2x256xf32>
      %cst_32 = arith.constant dense<0.000000e+00> : vector<2xf32>
      %53 = vector.multi_reduction <add>, %52, %cst_32 [1] : vector<2x256xf32> to vector<2xf32>
      %54 = vector.shape_cast %53 : vector<2xf32> to vector<2x1xf32>
      %55 = arith.mulf %54, %48 : vector<2x1xf32>
      %56 = vector.broadcast %55 : vector<2x1xf32> to vector<2x256xf32>
      %57 = arith.mulf %56, %2 : vector<2x256xf32>
      %58 = arith.subf %51, %57 : vector<2x256xf32>
      %59 = arith.mulf %58, %58 : vector<2x256xf32>
      %cst_33 = arith.constant dense<0.000000e+00> : vector<2xf32>
      %60 = vector.multi_reduction <add>, %59, %cst_33 [1] : vector<2x256xf32> to vector<2xf32>
      %61 = vector.shape_cast %60 : vector<2xf32> to vector<2x1xf32>
      %62 = arith.mulf %cst_26, %cst_26 : f32
      %63 = vector.broadcast %62 : f32 to vector<2x1xf32>
      %64 = arith.maximumf %61, %63 : vector<2x1xf32>
      %65 = math.rsqrt %64 : vector<2x1xf32>
      %66 = vector.broadcast %65 : vector<2x1xf32> to vector<2x256xf32>
      %67 = arith.mulf %58, %66 : vector<2x256xf32>
      %68 = arith.mulf %67, %67 : vector<2x256xf32>
      %cst_34 = arith.constant dense<0.000000e+00> : vector<2xf32>
      %69 = vector.multi_reduction <add>, %68, %cst_34 [1] : vector<2x256xf32> to vector<2xf32>
      %70 = vector.shape_cast %69 : vector<2xf32> to vector<2x1xf32>
      %71 = vector.broadcast %cst_26 : f32 to vector<2x1xf32>
      %72 = arith.maximumf %70, %71 : vector<2x1xf32>
      %73 = tpu.reciprocal %72 : vector<2x1xf32> -> vector<2x1xf32>
      %74 = arith.addf %49, %67 : vector<2x256xf32>
      %c0_35 = arith.constant 0 : index
      %c0_36 = arith.constant 0 : index
      %75 = vector.load %arg9[%c0_35, %c0_36] : memref<2x256xbf16, #tpu.memory_space<vmem>>, vector<2x256xbf16>
      %76 = arith.extf %75 : vector<2x256xbf16> to vector<2x256xf32>
      %77 = arith.mulf %76, %2 : vector<2x256xf32>
      %cst_37 = arith.constant dense<0.000000e+00> : vector<2xf32>
      %78 = vector.multi_reduction <add>, %77, %cst_37 [1] : vector<2x256xf32> to vector<2xf32>
      %79 = vector.shape_cast %78 : vector<2xf32> to vector<2x1xf32>
      %80 = arith.mulf %79, %48 : vector<2x1xf32>
      %81 = vector.broadcast %80 : vector<2x1xf32> to vector<2x256xf32>
      %82 = arith.mulf %81, %2 : vector<2x256xf32>
      %83 = arith.subf %76, %82 : vector<2x256xf32>
      %84 = arith.mulf %83, %67 : vector<2x256xf32>
      %cst_38 = arith.constant dense<0.000000e+00> : vector<2xf32>
      %85 = vector.multi_reduction <add>, %84, %cst_38 [1] : vector<2x256xf32> to vector<2xf32>
      %86 = vector.shape_cast %85 : vector<2xf32> to vector<2x1xf32>
      %87 = arith.mulf %86, %73 : vector<2x1xf32>
      %88 = vector.broadcast %87 : vector<2x1xf32> to vector<2x256xf32>
      %89 = arith.mulf %88, %67 : vector<2x256xf32>
      %90 = arith.subf %83, %89 : vector<2x256xf32>
      %91 = arith.mulf %90, %90 : vector<2x256xf32>
      %cst_39 = arith.constant dense<0.000000e+00> : vector<2xf32>
      %92 = vector.multi_reduction <add>, %91, %cst_39 [1] : vector<2x256xf32> to vector<2xf32>
      %93 = vector.shape_cast %92 : vector<2xf32> to vector<2x1xf32>
      %94 = arith.mulf %cst_26, %cst_26 : f32
      %95 = vector.broadcast %94 : f32 to vector<2x1xf32>
      %96 = arith.maximumf %93, %95 : vector<2x1xf32>
      %97 = math.rsqrt %96 : vector<2x1xf32>
      %98 = vector.broadcast %97 : vector<2x1xf32> to vector<2x256xf32>
      %99 = arith.mulf %90, %98 : vector<2x256xf32>
      %100 = arith.addf %74, %99 : vector<2x256xf32>
      %101 = vector.broadcast %0 : f32 to vector<2x256xf32>
      %102 = arith.mulf %100, %101 : vector<2x256xf32>
      %103 = arith.subf %3, %102 : vector<2x256xf32>
      %104 = vector.shape_cast %6 : vector<2x1xi1> to vector<2x1xi1>
      %105 = vector.broadcast %104 : vector<2x1xi1> to vector<2x256xi1>
      %106 = arith.select %105, %103, %29 : vector<2x256xi1>, vector<2x256xf32>
      %c0_40 = arith.constant 0 : index
      %c0_41 = arith.constant 0 : index
      %107 = vector.load %arg10[%c0_40, %c0_41] : memref<2x256xf32, #tpu.memory_space<vmem>>, vector<2x256xf32>
      tpu.vector_store %arg10[%c0_40, %c0_41], %106 {strides = array<i32>} : memref<2x256xf32, #tpu.memory_space<vmem>>, vector<2x256xf32>,
    } else {
    }
    %true = arith.constant true
    %40 = arith.xori %37, %true : i1
    %41 = arith.extui %40 : i1 to i32
    %c0_i32_27 = arith.constant 0 : i32
    %42 = arith.cmpi ne, %41, %c0_i32_27 : i32
    scf.if %42 {
      %c0_28 = arith.constant 0 : index
      %c0_29 = arith.constant 0 : index
      %43 = vector.load %arg10[%c0_28, %c0_29] : memref<2x256xf32, #tpu.memory_space<vmem>>, vector<2x256xf32>
      tpu.vector_store %arg10[%c0_28, %c0_29], %29 {strides = array<i32>} : memref<2x256xf32, #tpu.memory_space<vmem>>, vector<2x256xf32>,
    } else {
    }
    return
  }
  func.func @transform_0(%arg0: i32) -> (i32, i32) {
    %c0_i32 = arith.constant 0 : i32
    %c0_i32_0 = arith.constant 0 : i32
    %c0_i32_1 = arith.constant 0 : i32
    return %c0_i32, %c0_i32_0 : i32, i32
  }
  func.func @transform_1(%arg0: i32) -> (i32, i32) {
    %c0_i32 = arith.constant 0 : i32
    %c0_i32_0 = arith.constant 0 : i32
    return %arg0, %c0_i32 : i32, i32
  }
  func.func @transform_2(%arg0: i32) -> (i32, i32) {
    %c0_i32 = arith.constant 0 : i32
    %c0_i32_0 = arith.constant 0 : i32
    return %arg0, %c0_i32 : i32, i32
  }
  func.func @transform_3(%arg0: i32) -> (i32, i32) {
    %c0_i32 = arith.constant 0 : i32
    %c0_i32_0 = arith.constant 0 : i32
    return %arg0, %c0_i32 : i32, i32
  }
  func.func @transform_4(%arg0: i32) -> (i32, i32) {
    %c0_i32 = arith.constant 0 : i32
    %c0_i32_0 = arith.constant 0 : i32
    return %arg0, %c0_i32 : i32, i32
  }
  func.func @transform_5(%arg0: i32) -> (i32, i32) {
    %c0_i32 = arith.constant 0 : i32
    %c0_i32_0 = arith.constant 0 : i32
    return %arg0, %c0_i32 : i32, i32
  }
  func.func @transform_6(%arg0: i32) -> (i32, i32) {
    %c0_i32 = arith.constant 0 : i32
    %c0_i32_0 = arith.constant 0 : i32
    return %arg0, %c0_i32 : i32, i32
  }
  func.func @transform_7(%arg0: i32) -> (i32, i32) {
    %c0_i32 = arith.constant 0 : i32
    %c0_i32_0 = arith.constant 0 : i32
    return %arg0, %c0_i32 : i32, i32
  }
  func.func @transform_8(%arg0: i32) -> (i32, i32) {
    %c0_i32 = arith.constant 0 : i32
    %c0_i32_0 = arith.constant 0 : i32
    return %arg0, %c0_i32 : i32, i32
  }
  func.func @transform_9(%arg0: i32) -> (i32, i32) {
    %c0_i32 = arith.constant 0 : i32
    %c0_i32_0 = arith.constant 0 : i32
    return %arg0, %c0_i32 : i32, i32
  }
  func.func @transform_10(%arg0: i32) -> (i32, i32) {
    %c0_i32 = arith.constant 0 : i32
    %c0_i32_0 = arith.constant 0 : i32
    return %arg0, %c0_i32 : i32, i32
  }
  func.func @transform_11(%arg0: i32) -> (i32, i32) {
    %c0_i32 = arith.constant 0 : i32
    %c0_i32_0 = arith.constant 0 : i32
    return %arg0, %c0_i32 : i32, i32
  }
}

</mosaic_0001>

<bundles_post_ra>
// kernel: step.1
= control target key start
LH: loop header
LB: loop body
LE: loop exit
PB: predicated region body
PF: predicated region fallthrough
CT: control target
= control target key end

     0   :  { %17 = vsyncpa [#allocation3], 0  ;;  %s625_s0 = inlined_call_operand.vmem [shape: f32[1,2], index: 0, kind: input, shape index: {}]   ;;  %s626_s1 = inlined_call_operand.vmem [shape: f32[2,256], index: 1, kind: input, shape index: {}]   ;;  %s627_s2 = inlined_call_operand.vmem [shape: f32[2,256], index: 2, kind: input, shape index: {}]   ;;  %s628_s3 = inlined_call_operand.vmem [shape: f32[2,2], index: 3, kind: input, shape index: {}]   ;;  %s629_s4 = inlined_call_operand.vmem [shape: f32[2,2], index: 4, kind: input, shape index: {}, may-alias: {4,10}]   ;;  %s630_s5 = inlined_call_operand.vmem [shape: f32[2,256], index: 5, kind: input, shape index: {}, may-alias: {5,11}]   ;;  %s631_s6 = inlined_call_operand.vmem [shape: f32[2,1], index: 6, kind: input, shape index: {}]   ;;  %s632_s7 = inlined_call_operand.vmem [shape: bf16[2,256], index: 7, kind: input, shape index: {}]   ;;  %s633_s8 = inlined_call_operand.vmem [shape: bf16[2,256], index: 8, kind: input, shape index: {}]   ;;  %s634_s9 = inlined_call_operand.vmem [shape: f32[2,256], index: 9, kind: output, shape index: {0}]   ;;  %s635_s10 = inlined_call_operand.vmem [shape: f32[2,2], index: 10, kind: output, shape index: {1}, may-alias: {4,10}]   ;;  %s636_s11 = inlined_call_operand.vmem [shape: f32[2,256], index: 11, kind: output, shape index: {2}, may-alias: {5,11}]  }
   0x1   :  { %s24_s19 = sshll.u32 %s625_s0, 4  ;;  %s25_s19 = int_to_ptr.vmem [resolvable:$true] %s24_s19 }
   0x2   :  { %s433_s20 = scalar_lea.vmem %s25_s19, 16  ;;  %p438_p1 = scmp.lt.s32.totalorder %s25_s19, %s25_s19 }
   0x3   :  { %p434_p0 = scmp.ne.s32.totalorder %s25_s19, %s433_s20  ;;  %p439_p2 = scmp.lt.s32.totalorder %s433_s20, %s433_s20 }
   0x5   :  { %p440_p3 = por %p439_p2, %p438_p1 }
   0x7   :  { %p441_p4 = pnand %p440_p3, %p434_p0 }
   0x9   :  { %444 = shalt.err (!%p441_p4)
}
   0xa   :  { %s447_s21 = smov [#allocation2]  }
   0xb   :  { %27 = dma.vmem_to_smem %s25_s19, 16, %s447_s21, [#allocation3]  }
   0xc   :  { %445 = dma.done.wait [#allocation3], 16  }
   0xd   :  { %446 = vsyncadd [#allocation3], 4294967280 }
   0xe   :  { %47 = sfence }
   0xf   :  { %v54_v0 = vld [vmem:[%s628_s3] sm:$0x3]  ;;  %vm58_vm0 = vcmask 9216   ;;  %v448_v3 = vmov 0.0   ;;  %vm112_vm3 = vcmask 1024   ;;  %v449_v8 = vmov 0  }
  0x10   :  { %v55_v1 = vld [vmem:[%s629_s4] sm:$0x3]  ;;  %421 = vset.pattern.permute.xlu1 %v449_v8  ;;  %422 = vset.pattern.permute.xlu0 %v449_v8  ;;  %s531_s3 = sld [smem:[#allocation2]]  ;;  %s409_s4 = sld [smem:[#allocation2 + $0x1]]  ;;  %v450_v23 = vmov 1983009808   ;;  %v76_v25 = vlaneseq }
  0x11   :  { %vm56_vm1 = vcmp.ge.f32.partialorder %v55_v1, %v54_v0  ;;  %v525_v2 = vld [vmem:[%s631_s6] sm:$0x3]  ;;  %v74_v24 = vunpack.c.l.s4 %v450_v23 }
  0x12   :  { %v57_v4 = vsel %vm56_vm1, 1.0, %v448_v3  ;;  %vm53_vm2 = vcmp.gt.f32.partialorder %v525_v2, 0.0  ;;  %v538_v11 = vld [vmem:[%s626_s1] sm:$0xf]  ;;  %v552_v27 = vshrl.u32 %v76_v25, 7 }
  0x13   :  { %v59_v5 = vsel %vm58_vm0, %v57_v4, inf  ;;  %v111_v6 = vsel %vm53_vm2, 1.0, %v448_v3  ;;  %v544_v17 = vld [vmem:[%s627_s2] sm:$0xf]  ;;  %v75_v26 = vunpack.c.0.s8 %v74_v24 }
  0x14   :  { %60 = vmin.xlane.f32.xlu0 %v59_v5  ;;  %v113_v7 = vsel %vm112_vm3, %v111_v6, -inf  ;;  %v410_v30 = vld.sshfl [vmem:[%s630_s5] sm:$0x33 pattern:$0x76325410] }
  0x15   :  { %v555_v28 = vsub.s32 %v75_v26, %v552_v27  ;;  %v91_v31 = vcombine.high %v410_v30, %v410_v30 }
  0x16   :  { %v108_v14 = vstv %s409_s4 }
  0x17   :  { %v109_v15 = vmul.f32 %v108_v14, %v538_v11  ;;  %v79_v29 = vrot.slane %v544_v17, %v555_v28 }
  0x18   :  { %114 = vmax.xlane.f32.xlu0 %v113_v7 }
  0x19   :  { %v547_v18 = vsub.f32 %v544_v17, %v109_v15  ;;  %v80_v32 = vcombine.high %v79_v29, %v79_v29 }
  0xa1   :  { %v61_v9 = vpop.xlane.xlu0 %60 }
  0xa2   :  { %vm62_vm4 = vcmp.gt.f32.partialorder %v61_v9, 0.0 }
  0xa3   :  { %vm63_vm5 = vmand %vm53_vm2, %vm62_vm4 }
  0xa4   :  { %v64_v10 = vsel %vm63_vm5, 1, %v449_v8 }
  0xa5   :  { %66 = vperm.xlu1 %421, %v64_v10   ;;  %v115_v12 = vpop.xlane.xlu0 %114 }
  0xa6   :  { %v116_v13 = vrot.slane %v115_v12, 4 }
  0xa8   :  { %v117_v16 = vmax.f32 %v115_v12, %v116_v13 }
  0xaa   :  { %v118_v19 = vrot.slane %v117_v16, 2 }
  0xac   :  { %v119_v20 = vmax.f32 %v117_v16, %v118_v19 }
  0xae   :  { %v120_v21 = vrot.slane %v119_v20, 1 }
  0xb0   :  { %v121_v22 = vmax.f32 %v119_v20, %v120_v21 }
  0xb2   :  { %413 = vpush %v121_v22 }
  0xe3   :  { %s549_s1 = spop %413 }
  0xe4   :  { %p123_p5 = scmp.gt.f32.partialorder %s549_s1, 0.0 }
  0xe5   :  { %v127_v38 = vmul.f32 (%p123_p5), %v538_v11, %v538_v11  ;;  %v147_v39 = vld [vmem:[%s632_s7] sm:$0x3] (%p123_p5)  ;;  %vm139_vm7 = vcmask (%p123_p5), 1041408   ;;  %v174_v54 = vrot.slane (%p123_p5), %v538_v11, %v555_v28  ;;  %v451_v19 = vmov (%p123_p5), 269488144  }
  0xe6   :  { %v148_v40 = vunpack.c.l.bf16 (%p123_p5), %v147_v39  ;;  %v241_v56 = vld [vmem:[%s633_s8] sm:$0x3] (%p123_p5)  ;;  %v213_v20 = vunpack.c.l.s4 (%p123_p5), %v451_v19 }
  0xe7   :  { %v135_v41 = vrot.slane (%p123_p5), %v127_v38, %v555_v28  ;;  %v175_v57 = vcombine.high (%p123_p5), %v174_v54, %v174_v54  ;;  %v242_v60 = vunpack.c.l.bf16 (%p123_p5), %v241_v56 }
  0xe8   :  { %v149_v42 = vmul.f32 (%p123_p5), %v148_v40, %v538_v11  ;;  %v214_v23 = vunpack.c.0.s8 (%p123_p5), %v213_v20 }
  0xe9   :  { %v136_v43 = vcombine.high (%p123_p5), %v135_v41, %v135_v41  ;;  %v140_v44 = vsel (%p123_p5), %vm139_vm7, %v135_v41, 0.0 }
  0xea   :  { %v157_v45 = vrot.slane (%p123_p5), %v149_v42, %v555_v28 }
  0xeb   :  { %v141_v46 = vsel (%p123_p5), %vm139_vm7, %v136_v43, 0.0 }
  0xec   :  { %v142_v47 = vadd.f32 (%p123_p5), %v141_v46, %v140_v44  ;;  %v158_v48 = vcombine.high (%p123_p5), %v157_v45, %v157_v45  ;;  %v161_v49 = vsel (%p123_p5), %vm139_vm7, %v157_v45, 0.0  ;;  %v452_v46 = vmov (%p123_p5), 0  }
  0xed   :  { %423 = vset.pattern.permute.xlu1 (%p123_p5), %v452_v46  ;;  %424 = vset.pattern.permute.xlu0 (%p123_p5), %v452_v46 }
  0xee   :  { %143 = vadd.xlane.f32.xlu0 (%p123_p5), %v142_v47  ;;  %v162_v50 = vsel (%p123_p5), %vm139_vm7, %v158_v48, 0.0  ;;  %v351_v47 = vsel (%p123_p5), %vm53_vm2, 1, %v452_v46 }
  0xef   :  { %v163_v51 = vadd.f32 (%p123_p5), %v162_v50, %v161_v49 }
  0xf2   :  { %164 = vadd.xlane.f32.xlu0 (%p123_p5), %v163_v51 }
 0x123   :  { %126 = sbr.rel (!%p123_p5) target bundleno = 927 (0x39f), region = 45 }
 0x124   :  { %v67_v33 = vpop.permute.xlu1 %66 }
 0x125   :  { %vm68_vm6 = vcmp.eq.s32.totalorder %v67_v33, 1 }
 0x126   :  { %v69_v34 = vsel %vm68_vm6, %v54_v0, %v55_v1  ;;  %v94_v35 = vsel %vm68_vm6, %v79_v29, %v410_v30  ;;  %v95_v36 = vsel %vm68_vm6, %v80_v32, %v91_v31  ;;  %v243_v0 = vmul.f32 (%p123_p5), %v242_v60, %v538_v11 }
 0x127   :  { %70 = vst.msk [vmem:[%s635_s10] sm:$0x3] %vm58_vm0, %v69_v34  ;;  %v98_v37 = vcombine.low %v94_v35, %v95_v36  ;;  %v217_v29 = vsub.s32 (%p123_p5), %v214_v23, %v552_v27 }
 0x128   :  { %v251_v4 = vrot.slane (%p123_p5), %v243_v0, %v555_v28 }
 0x129   :  { %411 = vst.sshfl [vmem:[%s636_s11] sm:$0x33 pattern:$0x76325410] %v98_v37 }
 0x12a   :  { %v252_v7 = vcombine.high %v251_v4, %v251_v4  ;;  %v255_v12 = vsel %vm139_vm7, %v251_v4, 0.0 }
 0x12c   :  { %v256_v13 = vsel %vm139_vm7, %v252_v7, 0.0  ;;  %v348_v7 = vstv %s531_s3 }
 0x12d   :  { %v257_v11 = vadd.f32 %v256_v13, %v255_v12 }
 0x17b   :  { %v144_v52 = vpop.xlane.xlu0 %143 }
 0x17c   :  { %v145_v53 = vmax.f32 %v144_v52, 1e-12 }
 0x17e   :  { %425 = vrcp.f32 %v145_v53 }
 0x17f   :  { %v165_v55 = vpop.xlane.xlu0 %164 }
 0x188   :  { %v426_v58 = vpop.eup %425 }
 0x189   :  { %v166_v59 = vmul.f32 %v426_v58, %v165_v55 }
 0x18b   :  { %v178_v61 = vmul.f32 %v174_v54, %v166_v59  ;;  %v179_v62 = vmul.f32 %v175_v57, %v166_v59 }
 0x18d   :  { %v182_v63 = vcombine.low %v178_v61, %v179_v62 }
 0x18f   :  { %v189_v1 = vrot.slane %v182_v63, %v555_v28 }
 0x191   :  { %v191_v3 = vsub.f32 %v148_v40, %v189_v1 }
 0x193   :  { %v192_v5 = vmul.f32 %v191_v3, %v191_v3 }
 0x195   :  { %v200_v6 = vrot.slane %v192_v5, %v555_v28 }
 0x197   :  { %v201_v8 = vcombine.high %v200_v6, %v200_v6  ;;  %v204_v9 = vsel %vm139_vm7, %v200_v6, 0.0 }
 0x199   :  { %v205_v10 = vsel %vm139_vm7, %v201_v8, 0.0 }
 0x19a   :  { %v206_v14 = vadd.f32 %v205_v10, %v204_v9  ;;  %v374_v10 = vrot.slane %v547_v18, %v555_v28 }
 0x19c   :  { %207 = vadd.xlane.f32.xlu1 %v206_v14 }
 0x1a0   :  { %258 = vadd.xlane.f32.xlu1 %v257_v11  ;;  %v375_v11 = vcombine.high %v374_v10, %v374_v10 }
 0x229   :  { %v208_v15 = vpop.xlane.xlu1 %207 }
 0x22a   :  { %v209_v16 = vmax.f32 %v208_v15, 1e-24 }
 0x22c   :  { %427 = vrsqrt.f32 %v209_v16 }
 0x22d   :  { %v259_v21 = vpop.xlane.xlu1 %258 }
 0x22e   :  { %v260_v22 = vmul.f32 %v426_v58, %v259_v21 }
 0x230   :  { %v261_v24 = vmul.f32 %v260_v22, %v174_v54  ;;  %v262_v25 = vmul.f32 %v260_v22, %v175_v57 }
 0x232   :  { %v265_v26 = vcombine.low %v261_v24, %v262_v25 }
 0x234   :  { %v272_v30 = vrot.slane %v265_v26, %v555_v28 }
 0x236   :  { %v428_v31 = vpop.eup %427  ;;  %v274_v34 = vsub.f32 %v242_v60, %v272_v30 }
 0x237   :  { %v218_v32 = vrot.slane %v428_v31, %v217_v29 }
 0x239   :  { %v220_v33 = vmul.f32 %v218_v32, %v191_v3 }
 0x23b   :  { %v221_v35 = vmul.f32 %v220_v33, %v220_v33  ;;  %v275_v36 = vmul.f32 %v274_v34, %v220_v33  ;;  %v300_v50 = vrot.slane %v220_v33, %v555_v28 }
 0x23d   :  { %v229_v37 = vrot.slane %v221_v35, %v555_v28  ;;  %v283_v38 = vrot.slane %v275_v36, %v555_v28  ;;  %v301_v53 = vcombine.high %v300_v50, %v300_v50 }
 0x23f   :  { %v230_v39 = vcombine.high %v229_v37, %v229_v37  ;;  %v284_v40 = vcombine.high %v283_v38, %v283_v38  ;;  %v233_v41 = vsel %vm139_vm7, %v229_v37, 0.0  ;;  %v287_v27 = vsel %vm139_vm7, %v283_v38, 0.0 }
 0x241   :  { %v234_v42 = vsel %vm139_vm7, %v230_v39, 0.0  ;;  %v288_v43 = vsel %vm139_vm7, %v284_v40, 0.0 }
 0x242   :  { %v235_v44 = vadd.f32 %v234_v42, %v233_v41  ;;  %v289_v45 = vadd.f32 %v288_v43, %v287_v27 }
 0x244   :  { %236 = vadd.xlane.f32.xlu0 %v235_v44  ;;  %290 = vadd.xlane.f32.xlu1 %v289_v45 }
 0x255   :  { %353 = vperm.xlu1 %423, %v351_v47  }
 0x2d1   :  { %v237_v48 = vpop.xlane.xlu0 %236  ;;  %v291_v52 = vpop.xlane.xlu1 %290 }
 0x2d2   :  { %v238_v49 = vmax.f32 %v237_v48, 1e-12 }
 0x2d4   :  { %429 = vrcp.f32 %v238_v49 }
 0x2d5   :  { %v354_v13 = vpop.permute.xlu1 %353 }
 0x2d6   :  { %vm355_vm8 = vcmp.eq.s32.totalorder %v354_v13, 1 }
 0x2de   :  { %v430_v51 = vpop.eup %429 }
 0x2df   :  { %v292_v54 = vmul.f32 %v430_v51, %v291_v52 }
 0x2e1   :  { %v304_v55 = vmul.f32 %v300_v50, %v292_v54  ;;  %v305_v56 = vmul.f32 %v301_v53, %v292_v54 }
 0x2e3   :  { %v308_v57 = vcombine.low %v304_v55, %v305_v56 }
 0x2e5   :  { %v315_v58 = vrot.slane %v308_v57, %v555_v28 }
 0x2e7   :  { %v317_v59 = vsub.f32 %v274_v34, %v315_v58 }
 0x2e9   :  { %v318_v2 = vmul.f32 %v317_v59, %v317_v59 }
 0x2eb   :  { %v326_v60 = vrot.slane %v318_v2, %v555_v28 }
 0x2ed   :  { %v327_v61 = vcombine.high %v326_v60, %v326_v60  ;;  %v330_v62 = vsel %vm139_vm7, %v326_v60, 0.0 }
 0x2ef   :  { %v331_v63 = vsel %vm139_vm7, %v327_v61, 0.0 }
 0x2f0   :  { %v332_v0 = vadd.f32 %v331_v63, %v330_v62 }
 0x2f2   :  { %333 = vadd.xlane.f32.xlu0 %v332_v0 }
 0x37f   :  { %v334_v1 = vpop.xlane.xlu0 %333 }
 0x380   :  { %v335_v3 = vmax.f32 %v334_v1, 1e-24 }
 0x382   :  { %431 = vrsqrt.f32 %v335_v3 }
 0x38c   :  { %v432_v4 = vpop.eup %431 }
 0x38d   :  { %v344_v5 = vrot.slane %v432_v4, %v217_v29 }
 0x38f   :  { %v346_v6 = vmul.f32 %v344_v5, %v317_v59 }
 0x391   :  { %v347_v8 = vadd.f32 %v346_v6, %v220_v33 }
 0x393   :  { %v349_v9 = vmul.f32 %v348_v7, %v347_v8 }
 0x395   :  { %v350_v12 = vsub.f32 %v544_v17, %v349_v9 }
 0x397   :  { %v363_v14 = vrot.slane %v350_v12, %v555_v28 }
 0x399   :  { %v364_v15 = vcombine.high %v363_v14, %v363_v14  ;;  %v378_v16 = vsel %vm355_vm8, %v363_v14, %v374_v10 }
 0x39b   :  { %v379_v19 = vsel %vm355_vm8, %v364_v15, %v375_v11 }
 0x39c   :  { %v382_v20 = vcombine.low %v378_v16, %v379_v19 }
 0x39e   :  { %412 = vst.sshfl [vmem:[%s634_s9] sm:$0x33 pattern:$0x76325410] %v382_v20 }
 0x39f PF:  { %394 = sbr.rel (%p123_p5) target bundleno = 934 (0x3a6), region = 49  ;;  %395 = vst [vmem:[%s634_s9] sm:$0xf] (!%p123_p5), %v547_v18 }
 0x3a6 PF:  { %408 = vsyncpa [#allocation3], 1 }

</bundles_post_ra>
